<compile_context>
chip_gen: v5e
topology: v5e:2x2
jax: 0.10.0
libtpu: 0.0.40
codegen_flags: <defaults>
</compile_context>

<pallas_src>
import jax
import jax.numpy as jnp
import numpy as np
from jax.experimental import pallas as pl
from jax.experimental.pallas import tpu as pltpu


def lstm_kernel(x2d_ref, wih_ref, whh_ref, b_ref, wout_ref, bout_ref, out_ref):
    B = out_ref.shape[0]          # batch
    H = whh_ref.shape[0]          # hidden
    seq = x2d_ref.shape[0] // B   # timesteps

    # ---- Phase 1: time-parallel input projection as ONE MXU GEMM -------------
    # (seq*B, I) @ (I, 4H) + fused bias -> gate pre-activations for every step.
    gx = (
        jnp.dot(x2d_ref[...], wih_ref[...], preferred_element_type=jnp.float32)
        + b_ref[...]
    )

    whh = whh_ref[...]            # (H, 4H) -- load once, reuse every step

    # ---- Phase 2: sequential recurrence; h/c carried in vregs ----------------
    h = jnp.zeros((B, H), jnp.float32)
    c = jnp.zeros((B, H), jnp.float32)
    for t in range(seq):          # seq is small & static -> full unroll, static slices
        gates = gx[t * B:(t + 1) * B, :] + jnp.dot(
            h, whh, preferred_element_type=jnp.float32)
        # PyTorch gate order: (i, f, g, o)
        i_g = jax.nn.sigmoid(gates[:, 0 * H:1 * H])
        f_g = jax.nn.sigmoid(gates[:, 1 * H:2 * H])
        g_g = jnp.tanh(gates[:, 2 * H:3 * H])
        o_g = jax.nn.sigmoid(gates[:, 3 * H:4 * H])
        c = f_g * c + i_g * g_g
        h = o_g * jnp.tanh(c)

    # ---- Output projection (lane-dense padded width) --------------------------
    out_ref[...] = (
        jnp.dot(h, wout_ref[...], preferred_element_type=jnp.float32)
        + bout_ref[...]
    ).astype(out_ref.dtype)


def lstm_forward(x, w_ih, w_hh, b_ih, b_hh, w_out, b_out):
    """x: (seq, B, I). Returns (B, n_out) = Linear(h_T)."""
    seq, B, I = x.shape
    H = w_hh.shape[1]
    n_out = w_out.shape[0]
    n_out_pad = ((n_out + 127) // 128) * 128   # lane-dense output width

    # Pre-transpose / pad so the kernel does plain row-major, lane-dense matmuls.
    x2d = x.reshape(seq * B, I).astype(jnp.float32)        # rows for phase-1 GEMM
    wih_t = w_ih.T.astype(jnp.float32)                     # (I, 4H)
    whh_t = w_hh.T.astype(jnp.float32)                     # (H, 4H)
    b = (b_ih + b_hh).reshape(1, 4 * H).astype(jnp.float32)
    wout_t = jnp.zeros((H, n_out_pad), jnp.float32).at[:, :n_out].set(w_out.T)
    bout = jnp.zeros((1, n_out_pad), jnp.float32).at[:, :n_out].set(
        b_out.reshape(1, n_out))

    grid_spec = pltpu.PrefetchScalarGridSpec(
        num_scalar_prefetch=0,
        grid=(1,),   # single step: recurrence runs fully inside the kernel
        in_specs=[
            pl.BlockSpec((seq * B, I), lambda i: (0, 0)),        # x rows
            pl.BlockSpec((I, 4 * H), lambda i: (0, 0)),          # W_ih^T
            pl.BlockSpec((H, 4 * H), lambda i: (0, 0)),          # W_hh^T
            pl.BlockSpec((1, 4 * H), lambda i: (0, 0)),          # fused bias
            pl.BlockSpec((H, n_out_pad), lambda i: (0, 0)),      # W_out^T (padded)
            pl.BlockSpec((1, n_out_pad), lambda i: (0, 0)),      # b_out (padded)
        ],
        out_specs=pl.BlockSpec((B, n_out_pad), lambda i: (0, 0)),
    )

    out_pad = pl.pallas_call(
        lstm_kernel,
        out_shape=jax.ShapeDtypeStruct((B, n_out_pad), jnp.float32),
        grid_spec=grid_spec,
        compiler_params=pltpu.CompilerParams(
            dimension_semantics=("arbitrary",)),
    )(x2d, wih_t, whh_t, b, wout_t, bout)

    return out_pad[:, :n_out].astype(x.dtype)


def lstm_reference(x, w_ih, w_hh, b_ih, b_hh, w_out, b_out):
    """Pure-JAX reference mirroring torch.nn.LSTM + Linear."""
    seq, B, I = x.shape
    H = w_hh.shape[1]
    h = jnp.zeros((B, H), jnp.float32)
    c = jnp.zeros((B, H), jnp.float32)

    def step(carry, x_t):
        h, c = carry
        gates = x_t @ w_ih.T + b_ih + h @ w_hh.T + b_hh
        i = jax.nn.sigmoid(gates[:, 0 * H:1 * H])
        f = jax.nn.sigmoid(gates[:, 1 * H:2 * H])
        g = jnp.tanh(gates[:, 2 * H:3 * H])
        o = jax.nn.sigmoid(gates[:, 3 * H:4 * H])
        c = f * c + i * g
        h = o * jnp.tanh(c)
        return (h, c), None

    (h, _), _ = jax.lax.scan(step, (h, c), x)
    return h @ w_out.T + b_out


if __name__ == "__main__":
    seq_len, batch, n_inputs, n_hidden, n_outputs = 8, 2, 4, 32, 3

    key = jax.random.PRNGKey(0)
    k_x, k_wih, k_whh, k_bih, k_bhh, k_wout = jax.random.split(key, 6)

    # Deterministic param init mimicking PyTorch defaults:
    #   nn.LSTM params ~ U(-1/sqrt(H), 1/sqrt(H)); to_out.weight ~ N(0, 0.1); bias 0.
    bound = 1.0 / np.sqrt(n_hidden)
    w_ih = jax.random.uniform(k_wih, (4 * n_hidden, n_inputs), jnp.float32, -bound, bound)
    w_hh = jax.random.uniform(k_whh, (4 * n_hidden, n_hidden), jnp.float32, -bound, bound)
    b_ih = jax.random.uniform(k_bih, (4 * n_hidden,), jnp.float32, -bound, bound)
    b_hh = jax.random.uniform(k_bhh, (4 * n_hidden,), jnp.float32, -bound, bound)
    w_out = 0.1 * jax.random.normal(k_wout, (n_outputs, n_hidden), jnp.float32)
    b_out = jnp.zeros((n_outputs,), jnp.float32)

    x = jax.random.normal(k_x, (seq_len, batch, n_inputs), jnp.float32)

    out = lstm_forward(x, w_ih, w_hh, b_ih, b_hh, w_out, b_out)
    out = jax.block_until_ready(out)

    ref = jax.block_until_ready(
        lstm_reference(x, w_ih, w_hh, b_ih, b_hh, w_out, b_out))

    assert out.shape == (batch, n_outputs)
    np.testing.assert_allclose(np.asarray(out), np.asarray(ref), rtol=1e-5, atol=1e-5)

    print("KERNEL_OK")
</pallas_src>

<mosaic_0001>
module attributes {stable_mosaic.version = 11 : i64} {
  func.func @lstm_kernel(%arg0: i32, %arg1: memref<16x4xf32, #tpu.memory_space<vmem>>, %arg2: memref<4x128xf32, #tpu.memory_space<vmem>>, %arg3: memref<32x128xf32, #tpu.memory_space<vmem>>, %arg4: memref<1x128xf32, #tpu.memory_space<vmem>>, %arg5: memref<32x128xf32, #tpu.memory_space<vmem>>, %arg6: memref<1x128xf32, #tpu.memory_space<vmem>>, %arg7: memref<2x128xf32, #tpu.memory_space<vmem>>) attributes {dimension_semantics = [#tpu.dimension_semantics<arbitrary>], iteration_bounds = array<i64: 1>, scalar_prefetch = 0 : i64, scratch_operands = 0 : i64, tpu.core_type = #tpu.core_type<tc>, window_params = [{pipeline_mode = #tpu.pipeline_mode<synchronous>, transform_indices = @transform_0, window_bounds = array<i64: 16, 4>}, {pipeline_mode = #tpu.pipeline_mode<synchronous>, transform_indices = @transform_1, window_bounds = array<i64: 4, 128>}, {pipeline_mode = #tpu.pipeline_mode<synchronous>, transform_indices = @transform_2, window_bounds = array<i64: 32, 128>}, {pipeline_mode = #tpu.pipeline_mode<synchronous>, transform_indices = @transform_3, window_bounds = array<i64: 1, 128>}, {pipeline_mode = #tpu.pipeline_mode<synchronous>, transform_indices = @transform_4, window_bounds = array<i64: 32, 128>}, {pipeline_mode = #tpu.pipeline_mode<synchronous>, transform_indices = @transform_5, window_bounds = array<i64: 1, 128>}, {pipeline_mode = #tpu.pipeline_mode<synchronous>, transform_indices = @transform_6, window_bounds = array<i64: 2, 128>}]} {
    %c0 = arith.constant 0 : index
    %c0_0 = arith.constant 0 : index
    %0 = vector.load %arg1[%c0, %c0_0] : memref<16x4xf32, #tpu.memory_space<vmem>>, vector<16x4xf32>
    %c0_1 = arith.constant 0 : index
    %c0_2 = arith.constant 0 : index
    %1 = vector.load %arg2[%c0_1, %c0_2] : memref<4x128xf32, #tpu.memory_space<vmem>>, vector<4x128xf32>
    %cst = arith.constant dense<0.000000e+00> : vector<16x128xf32>
    %2 = tpu.matmul %0, %1, %cst {dimension_numbers = #tpu.dot_dimension_numbers<[1], [0], [0], [1], [0, 0, 1, 1], [], []>} : vector<16x4xf32>, vector<4x128xf32>, vector<16x128xf32> -> vector<16x128xf32>
    %c0_3 = arith.constant 0 : index
    %c0_4 = arith.constant 0 : index
    %3 = vector.load %arg4[%c0_3, %c0_4] : memref<1x128xf32, #tpu.memory_space<vmem>>, vector<1x128xf32>
    %4 = vector.broadcast %3 : vector<1x128xf32> to vector<16x128xf32>
    %5 = arith.addf %2, %4 : vector<16x128xf32>
    %c0_5 = arith.constant 0 : index
    %c0_6 = arith.constant 0 : index
    %6 = vector.load %arg3[%c0_5, %c0_6] : memref<32x128xf32, #tpu.memory_space<vmem>>, vector<32x128xf32>
    %cst_7 = arith.constant 0.000000e+00 : f32
    %7 = vector.broadcast %cst_7 : f32 to vector<2x32xf32>
    %cst_8 = arith.constant 0.000000e+00 : f32
    %8 = vector.broadcast %cst_8 : f32 to vector<2x32xf32>
    %9 = vector.extract_strided_slice %5 {offsets = [0, 0], sizes = [2, 128], strides = [1, 1]} : vector<16x128xf32> to vector<2x128xf32>
    %cst_9 = arith.constant dense<0.000000e+00> : vector<2x128xf32>
    %10 = tpu.matmul %7, %6, %cst_9 {dimension_numbers = #tpu.dot_dimension_numbers<[1], [0], [0], [1], [0, 0, 1, 1], [], []>} : vector<2x32xf32>, vector<32x128xf32>, vector<2x128xf32> -> vector<2x128xf32>
    %11 = arith.addf %9, %10 : vector<2x128xf32>
    %12 = vector.extract_strided_slice %11 {offsets = [0, 0], sizes = [2, 32], strides = [1, 1]} : vector<2x128xf32> to vector<2x32xf32>
    %13 = arith.negf %12 : vector<2x32xf32>
    %14 = math.exp %13 : vector<2x32xf32>
    %cst_10 = arith.constant 1.000000e+00 : f32
    %15 = vector.broadcast %cst_10 : f32 to vector<2x32xf32>
    %16 = arith.addf %15, %14 : vector<2x32xf32>
    %17 = arith.divf %15, %16 : vector<2x32xf32>
    %18 = vector.extract_strided_slice %11 {offsets = [0, 32], sizes = [2, 32], strides = [1, 1]} : vector<2x128xf32> to vector<2x32xf32>
    %19 = arith.negf %18 : vector<2x32xf32>
    %20 = math.exp %19 : vector<2x32xf32>
    %cst_11 = arith.constant 1.000000e+00 : f32
    %21 = vector.broadcast %cst_11 : f32 to vector<2x32xf32>
    %22 = arith.addf %21, %20 : vector<2x32xf32>
    %23 = arith.divf %21, %22 : vector<2x32xf32>
    %24 = vector.extract_strided_slice %11 {offsets = [0, 64], sizes = [2, 32], strides = [1, 1]} : vector<2x128xf32> to vector<2x32xf32>
    %25 = math.tanh %24 : vector<2x32xf32>
    %26 = vector.extract_strided_slice %11 {offsets = [0, 96], sizes = [2, 32], strides = [1, 1]} : vector<2x128xf32> to vector<2x32xf32>
    %27 = arith.negf %26 : vector<2x32xf32>
    %28 = math.exp %27 : vector<2x32xf32>
    %cst_12 = arith.constant 1.000000e+00 : f32
    %29 = vector.broadcast %cst_12 : f32 to vector<2x32xf32>
    %30 = arith.addf %29, %28 : vector<2x32xf32>
    %31 = arith.divf %29, %30 : vector<2x32xf32>
    %32 = arith.mulf %23, %8 : vector<2x32xf32>
    %33 = arith.mulf %17, %25 : vector<2x32xf32>
    %34 = arith.addf %32, %33 : vector<2x32xf32>
    %35 = math.tanh %34 : vector<2x32xf32>
    %36 = arith.mulf %31, %35 : vector<2x32xf32>
    %37 = vector.extract_strided_slice %5 {offsets = [2, 0], sizes = [2, 128], strides = [1, 1]} : vector<16x128xf32> to vector<2x128xf32>
    %cst_13 = arith.constant dense<0.000000e+00> : vector<2x128xf32>
    %38 = tpu.matmul %36, %6, %cst_13 {dimension_numbers = #tpu.dot_dimension_numbers<[1], [0], [0], [1], [0, 0, 1, 1], [], []>} : vector<2x32xf32>, vector<32x128xf32>, vector<2x128xf32> -> vector<2x128xf32>
    %39 = arith.addf %37, %38 : vector<2x128xf32>
    %40 = vector.extract_strided_slice %39 {offsets = [0, 0], sizes = [2, 32], strides = [1, 1]} : vector<2x128xf32> to vector<2x32xf32>
    %41 = arith.negf %40 : vector<2x32xf32>
    %42 = math.exp %41 : vector<2x32xf32>
    %cst_14 = arith.constant 1.000000e+00 : f32
    %43 = vector.broadcast %cst_14 : f32 to vector<2x32xf32>
    %44 = arith.addf %43, %42 : vector<2x32xf32>
    %45 = arith.divf %43, %44 : vector<2x32xf32>
    %46 = vector.extract_strided_slice %39 {offsets = [0, 32], sizes = [2, 32], strides = [1, 1]} : vector<2x128xf32> to vector<2x32xf32>
    %47 = arith.negf %46 : vector<2x32xf32>
    %48 = math.exp %47 : vector<2x32xf32>
    %cst_15 = arith.constant 1.000000e+00 : f32
    %49 = vector.broadcast %cst_15 : f32 to vector<2x32xf32>
    %50 = arith.addf %49, %48 : vector<2x32xf32>
    %51 = arith.divf %49, %50 : vector<2x32xf32>
    %52 = vector.extract_strided_slice %39 {offsets = [0, 64], sizes = [2, 32], strides = [1, 1]} : vector<2x128xf32> to vector<2x32xf32>
    %53 = math.tanh %52 : vector<2x32xf32>
    %54 = vector.extract_strided_slice %39 {offsets = [0, 96], sizes = [2, 32], strides = [1, 1]} : vector<2x128xf32> to vector<2x32xf32>
    %55 = arith.negf %54 : vector<2x32xf32>
    %56 = math.exp %55 : vector<2x32xf32>
    %cst_16 = arith.constant 1.000000e+00 : f32
    %57 = vector.broadcast %cst_16 : f32 to vector<2x32xf32>
    %58 = arith.addf %57, %56 : vector<2x32xf32>
    %59 = arith.divf %57, %58 : vector<2x32xf32>
    %60 = arith.mulf %51, %34 : vector<2x32xf32>
    %61 = arith.mulf %45, %53 : vector<2x32xf32>
    %62 = arith.addf %60, %61 : vector<2x32xf32>
    %63 = math.tanh %62 : vector<2x32xf32>
    %64 = arith.mulf %59, %63 : vector<2x32xf32>
    %65 = vector.extract_strided_slice %5 {offsets = [4, 0], sizes = [2, 128], strides = [1, 1]} : vector<16x128xf32> to vector<2x128xf32>
    %cst_17 = arith.constant dense<0.000000e+00> : vector<2x128xf32>
    %66 = tpu.matmul %64, %6, %cst_17 {dimension_numbers = #tpu.dot_dimension_numbers<[1], [0], [0], [1], [0, 0, 1, 1], [], []>} : vector<2x32xf32>, vector<32x128xf32>, vector<2x128xf32> -> vector<2x128xf32>
    %67 = arith.addf %65, %66 : vector<2x128xf32>
    %68 = vector.extract_strided_slice %67 {offsets = [0, 0], sizes = [2, 32], strides = [1, 1]} : vector<2x128xf32> to vector<2x32xf32>
    %69 = arith.negf %68 : vector<2x32xf32>
    %70 = math.exp %69 : vector<2x32xf32>
    %cst_18 = arith.constant 1.000000e+00 : f32
    %71 = vector.broadcast %cst_18 : f32 to vector<2x32xf32>
    %72 = arith.addf %71, %70 : vector<2x32xf32>
    %73 = arith.divf %71, %72 : vector<2x32xf32>
    %74 = vector.extract_strided_slice %67 {offsets = [0, 32], sizes = [2, 32], strides = [1, 1]} : vector<2x128xf32> to vector<2x32xf32>
    %75 = arith.negf %74 : vector<2x32xf32>
    %76 = math.exp %75 : vector<2x32xf32>
    %cst_19 = arith.constant 1.000000e+00 : f32
    %77 = vector.broadcast %cst_19 : f32 to vector<2x32xf32>
    %78 = arith.addf %77, %76 : vector<2x32xf32>
    %79 = arith.divf %77, %78 : vector<2x32xf32>
    %80 = vector.extract_strided_slice %67 {offsets = [0, 64], sizes = [2, 32], strides = [1, 1]} : vector<2x128xf32> to vector<2x32xf32>
    %81 = math.tanh %80 : vector<2x32xf32>
    %82 = vector.extract_strided_slice %67 {offsets = [0, 96], sizes = [2, 32], strides = [1, 1]} : vector<2x128xf32> to vector<2x32xf32>
    %83 = arith.negf %82 : vector<2x32xf32>
    %84 = math.exp %83 : vector<2x32xf32>
    %cst_20 = arith.constant 1.000000e+00 : f32
    %85 = vector.broadcast %cst_20 : f32 to vector<2x32xf32>
    %86 = arith.addf %85, %84 : vector<2x32xf32>
    %87 = arith.divf %85, %86 : vector<2x32xf32>
    %88 = arith.mulf %79, %62 : vector<2x32xf32>
    %89 = arith.mulf %73, %81 : vector<2x32xf32>
    %90 = arith.addf %88, %89 : vector<2x32xf32>
    %91 = math.tanh %90 : vector<2x32xf32>
    %92 = arith.mulf %87, %91 : vector<2x32xf32>
    %93 = vector.extract_strided_slice %5 {offsets = [6, 0], sizes = [2, 128], strides = [1, 1]} : vector<16x128xf32> to vector<2x128xf32>
    %cst_21 = arith.constant dense<0.000000e+00> : vector<2x128xf32>
    %94 = tpu.matmul %92, %6, %cst_21 {dimension_numbers = #tpu.dot_dimension_numbers<[1], [0], [0], [1], [0, 0, 1, 1], [], []>} : vector<2x32xf32>, vector<32x128xf32>, vector<2x128xf32> -> vector<2x128xf32>
    %95 = arith.addf %93, %94 : vector<2x128xf32>
    %96 = vector.extract_strided_slice %95 {offsets = [0, 0], sizes = [2, 32], strides = [1, 1]} : vector<2x128xf32> to vector<2x32xf32>
    %97 = arith.negf %96 : vector<2x32xf32>
    %98 = math.exp %97 : vector<2x32xf32>
    %cst_22 = arith.constant 1.000000e+00 : f32
    %99 = vector.broadcast %cst_22 : f32 to vector<2x32xf32>
    %100 = arith.addf %99, %98 : vector<2x32xf32>
    %101 = arith.divf %99, %100 : vector<2x32xf32>
    %102 = vector.extract_strided_slice %95 {offsets = [0, 32], sizes = [2, 32], strides = [1, 1]} : vector<2x128xf32> to vector<2x32xf32>
    %103 = arith.negf %102 : vector<2x32xf32>
    %104 = math.exp %103 : vector<2x32xf32>
    %cst_23 = arith.constant 1.000000e+00 : f32
    %105 = vector.broadcast %cst_23 : f32 to vector<2x32xf32>
    %106 = arith.addf %105, %104 : vector<2x32xf32>
    %107 = arith.divf %105, %106 : vector<2x32xf32>
    %108 = vector.extract_strided_slice %95 {offsets = [0, 64], sizes = [2, 32], strides = [1, 1]} : vector<2x128xf32> to vector<2x32xf32>
    %109 = math.tanh %108 : vector<2x32xf32>
    %110 = vector.extract_strided_slice %95 {offsets = [0, 96], sizes = [2, 32], strides = [1, 1]} : vector<2x128xf32> to vector<2x32xf32>
    %111 = arith.negf %110 : vector<2x32xf32>
    %112 = math.exp %111 : vector<2x32xf32>
    %cst_24 = arith.constant 1.000000e+00 : f32
    %113 = vector.broadcast %cst_24 : f32 to vector<2x32xf32>
    %114 = arith.addf %113, %112 : vector<2x32xf32>
    %115 = arith.divf %113, %114 : vector<2x32xf32>
    %116 = arith.mulf %107, %90 : vector<2x32xf32>
    %117 = arith.mulf %101, %109 : vector<2x32xf32>
    %118 = arith.addf %116, %117 : vector<2x32xf32>
    %119 = math.tanh %118 : vector<2x32xf32>
    %120 = arith.mulf %115, %119 : vector<2x32xf32>
    %121 = vector.extract_strided_slice %5 {offsets = [8, 0], sizes = [2, 128], strides = [1, 1]} : vector<16x128xf32> to vector<2x128xf32>
    %cst_25 = arith.constant dense<0.000000e+00> : vector<2x128xf32>
    %122 = tpu.matmul %120, %6, %cst_25 {dimension_numbers = #tpu.dot_dimension_numbers<[1], [0], [0], [1], [0, 0, 1, 1], [], []>} : vector<2x32xf32>, vector<32x128xf32>, vector<2x128xf32> -> vector<2x128xf32>
    %123 = arith.addf %121, %122 : vector<2x128xf32>
    %124 = vector.extract_strided_slice %123 {offsets = [0, 0], sizes = [2, 32], strides = [1, 1]} : vector<2x128xf32> to vector<2x32xf32>
    %125 = arith.negf %124 : vector<2x32xf32>
    %126 = math.exp %125 : vector<2x32xf32>
    %cst_26 = arith.constant 1.000000e+00 : f32
    %127 = vector.broadcast %cst_26 : f32 to vector<2x32xf32>
    %128 = arith.addf %127, %126 : vector<2x32xf32>
    %129 = arith.divf %127, %128 : vector<2x32xf32>
    %130 = vector.extract_strided_slice %123 {offsets = [0, 32], sizes = [2, 32], strides = [1, 1]} : vector<2x128xf32> to vector<2x32xf32>
    %131 = arith.negf %130 : vector<2x32xf32>
    %132 = math.exp %131 : vector<2x32xf32>
    %cst_27 = arith.constant 1.000000e+00 : f32
    %133 = vector.broadcast %cst_27 : f32 to vector<2x32xf32>
    %134 = arith.addf %133, %132 : vector<2x32xf32>
    %135 = arith.divf %133, %134 : vector<2x32xf32>
    %136 = vector.extract_strided_slice %123 {offsets = [0, 64], sizes = [2, 32], strides = [1, 1]} : vector<2x128xf32> to vector<2x32xf32>
    %137 = math.tanh %136 : vector<2x32xf32>
    %138 = vector.extract_strided_slice %123 {offsets = [0, 96], sizes = [2, 32], strides = [1, 1]} : vector<2x128xf32> to vector<2x32xf32>
    %139 = arith.negf %138 : vector<2x32xf32>
    %140 = math.exp %139 : vector<2x32xf32>
    %cst_28 = arith.constant 1.000000e+00 : f32
    %141 = vector.broadcast %cst_28 : f32 to vector<2x32xf32>
    %142 = arith.addf %141, %140 : vector<2x32xf32>
    %143 = arith.divf %141, %142 : vector<2x32xf32>
    %144 = arith.mulf %135, %118 : vector<2x32xf32>
    %145 = arith.mulf %129, %137 : vector<2x32xf32>
    %146 = arith.addf %144, %145 : vector<2x32xf32>
    %147 = math.tanh %146 : vector<2x32xf32>
    %148 = arith.mulf %143, %147 : vector<2x32xf32>
    %149 = vector.extract_strided_slice %5 {offsets = [10, 0], sizes = [2, 128], strides = [1, 1]} : vector<16x128xf32> to vector<2x128xf32>
    %cst_29 = arith.constant dense<0.000000e+00> : vector<2x128xf32>
    %150 = tpu.matmul %148, %6, %cst_29 {dimension_numbers = #tpu.dot_dimension_numbers<[1], [0], [0], [1], [0, 0, 1, 1], [], []>} : vector<2x32xf32>, vector<32x128xf32>, vector<2x128xf32> -> vector<2x128xf32>
    %151 = arith.addf %149, %150 : vector<2x128xf32>
    %152 = vector.extract_strided_slice %151 {offsets = [0, 0], sizes = [2, 32], strides = [1, 1]} : vector<2x128xf32> to vector<2x32xf32>
    %153 = arith.negf %152 : vector<2x32xf32>
    %154 = math.exp %153 : vector<2x32xf32>
    %cst_30 = arith.constant 1.000000e+00 : f32
    %155 = vector.broadcast %cst_30 : f32 to vector<2x32xf32>
    %156 = arith.addf %155, %154 : vector<2x32xf32>
    %157 = arith.divf %155, %156 : vector<2x32xf32>
    %158 = vector.extract_strided_slice %151 {offsets = [0, 32], sizes = [2, 32], strides = [1, 1]} : vector<2x128xf32> to vector<2x32xf32>
    %159 = arith.negf %158 : vector<2x32xf32>
    %160 = math.exp %159 : vector<2x32xf32>
    %cst_31 = arith.constant 1.000000e+00 : f32
    %161 = vector.broadcast %cst_31 : f32 to vector<2x32xf32>
    %162 = arith.addf %161, %160 : vector<2x32xf32>
    %163 = arith.divf %161, %162 : vector<2x32xf32>
    %164 = vector.extract_strided_slice %151 {offsets = [0, 64], sizes = [2, 32], strides = [1, 1]} : vector<2x128xf32> to vector<2x32xf32>
    %165 = math.tanh %164 : vector<2x32xf32>
    %166 = vector.extract_strided_slice %151 {offsets = [0, 96], sizes = [2, 32], strides = [1, 1]} : vector<2x128xf32> to vector<2x32xf32>
    %167 = arith.negf %166 : vector<2x32xf32>
    %168 = math.exp %167 : vector<2x32xf32>
    %cst_32 = arith.constant 1.000000e+00 : f32
    %169 = vector.broadcast %cst_32 : f32 to vector<2x32xf32>
    %170 = arith.addf %169, %168 : vector<2x32xf32>
    %171 = arith.divf %169, %170 : vector<2x32xf32>
    %172 = arith.mulf %163, %146 : vector<2x32xf32>
    %173 = arith.mulf %157, %165 : vector<2x32xf32>
    %174 = arith.addf %172, %173 : vector<2x32xf32>
    %175 = math.tanh %174 : vector<2x32xf32>
    %176 = arith.mulf %171, %175 : vector<2x32xf32>
    %177 = vector.extract_strided_slice %5 {offsets = [12, 0], sizes = [2, 128], strides = [1, 1]} : vector<16x128xf32> to vector<2x128xf32>
    %cst_33 = arith.constant dense<0.000000e+00> : vector<2x128xf32>
    %178 = tpu.matmul %176, %6, %cst_33 {dimension_numbers = #tpu.dot_dimension_numbers<[1], [0], [0], [1], [0, 0, 1, 1], [], []>} : vector<2x32xf32>, vector<32x128xf32>, vector<2x128xf32> -> vector<2x128xf32>
    %179 = arith.addf %177, %178 : vector<2x128xf32>
    %180 = vector.extract_strided_slice %179 {offsets = [0, 0], sizes = [2, 32], strides = [1, 1]} : vector<2x128xf32> to vector<2x32xf32>
    %181 = arith.negf %180 : vector<2x32xf32>
    %182 = math.exp %181 : vector<2x32xf32>
    %cst_34 = arith.constant 1.000000e+00 : f32
    %183 = vector.broadcast %cst_34 : f32 to vector<2x32xf32>
    %184 = arith.addf %183, %182 : vector<2x32xf32>
    %185 = arith.divf %183, %184 : vector<2x32xf32>
    %186 = vector.extract_strided_slice %179 {offsets = [0, 32], sizes = [2, 32], strides = [1, 1]} : vector<2x128xf32> to vector<2x32xf32>
    %187 = arith.negf %186 : vector<2x32xf32>
    %188 = math.exp %187 : vector<2x32xf32>
    %cst_35 = arith.constant 1.000000e+00 : f32
    %189 = vector.broadcast %cst_35 : f32 to vector<2x32xf32>
    %190 = arith.addf %189, %188 : vector<2x32xf32>
    %191 = arith.divf %189, %190 : vector<2x32xf32>
    %192 = vector.extract_strided_slice %179 {offsets = [0, 64], sizes = [2, 32], strides = [1, 1]} : vector<2x128xf32> to vector<2x32xf32>
    %193 = math.tanh %192 : vector<2x32xf32>
    %194 = vector.extract_strided_slice %179 {offsets = [0, 96], sizes = [2, 32], strides = [1, 1]} : vector<2x128xf32> to vector<2x32xf32>
    %195 = arith.negf %194 : vector<2x32xf32>
    %196 = math.exp %195 : vector<2x32xf32>
    %cst_36 = arith.constant 1.000000e+00 : f32
    %197 = vector.broadcast %cst_36 : f32 to vector<2x32xf32>
    %198 = arith.addf %197, %196 : vector<2x32xf32>
    %199 = arith.divf %197, %198 : vector<2x32xf32>
    %200 = arith.mulf %191, %174 : vector<2x32xf32>
    %201 = arith.mulf %185, %193 : vector<2x32xf32>
    %202 = arith.addf %200, %201 : vector<2x32xf32>
    %203 = math.tanh %202 : vector<2x32xf32>
    %204 = arith.mulf %199, %203 : vector<2x32xf32>
    %205 = vector.extract_strided_slice %5 {offsets = [14, 0], sizes = [2, 128], strides = [1, 1]} : vector<16x128xf32> to vector<2x128xf32>
    %cst_37 = arith.constant dense<0.000000e+00> : vector<2x128xf32>
    %206 = tpu.matmul %204, %6, %cst_37 {dimension_numbers = #tpu.dot_dimension_numbers<[1], [0], [0], [1], [0, 0, 1, 1], [], []>} : vector<2x32xf32>, vector<32x128xf32>, vector<2x128xf32> -> vector<2x128xf32>
    %207 = arith.addf %205, %206 : vector<2x128xf32>
    %208 = vector.extract_strided_slice %207 {offsets = [0, 0], sizes = [2, 32], strides = [1, 1]} : vector<2x128xf32> to vector<2x32xf32>
    %209 = arith.negf %208 : vector<2x32xf32>
    %210 = math.exp %209 : vector<2x32xf32>
    %cst_38 = arith.constant 1.000000e+00 : f32
    %211 = vector.broadcast %cst_38 : f32 to vector<2x32xf32>
    %212 = arith.addf %211, %210 : vector<2x32xf32>
    %213 = arith.divf %211, %212 : vector<2x32xf32>
    %214 = vector.extract_strided_slice %207 {offsets = [0, 32], sizes = [2, 32], strides = [1, 1]} : vector<2x128xf32> to vector<2x32xf32>
    %215 = arith.negf %214 : vector<2x32xf32>
    %216 = math.exp %215 : vector<2x32xf32>
    %cst_39 = arith.constant 1.000000e+00 : f32
    %217 = vector.broadcast %cst_39 : f32 to vector<2x32xf32>
    %218 = arith.addf %217, %216 : vector<2x32xf32>
    %219 = arith.divf %217, %218 : vector<2x32xf32>
    %220 = vector.extract_strided_slice %207 {offsets = [0, 64], sizes = [2, 32], strides = [1, 1]} : vector<2x128xf32> to vector<2x32xf32>
    %221 = math.tanh %220 : vector<2x32xf32>
    %222 = vector.extract_strided_slice %207 {offsets = [0, 96], sizes = [2, 32], strides = [1, 1]} : vector<2x128xf32> to vector<2x32xf32>
    %223 = arith.negf %222 : vector<2x32xf32>
    %224 = math.exp %223 : vector<2x32xf32>
    %cst_40 = arith.constant 1.000000e+00 : f32
    %225 = vector.broadcast %cst_40 : f32 to vector<2x32xf32>
    %226 = arith.addf %225, %224 : vector<2x32xf32>
    %227 = arith.divf %225, %226 : vector<2x32xf32>
    %228 = arith.mulf %219, %202 : vector<2x32xf32>
    %229 = arith.mulf %213, %221 : vector<2x32xf32>
    %230 = arith.addf %228, %229 : vector<2x32xf32>
    %231 = math.tanh %230 : vector<2x32xf32>
    %232 = arith.mulf %227, %231 : vector<2x32xf32>
    %c0_41 = arith.constant 0 : index
    %c0_42 = arith.constant 0 : index
    %233 = vector.load %arg5[%c0_41, %c0_42] : memref<32x128xf32, #tpu.memory_space<vmem>>, vector<32x128xf32>
    %cst_43 = arith.constant dense<0.000000e+00> : vector<2x128xf32>
    %234 = tpu.matmul %232, %233, %cst_43 {dimension_numbers = #tpu.dot_dimension_numbers<[1], [0], [0], [1], [0, 0, 1, 1], [], []>} : vector<2x32xf32>, vector<32x128xf32>, vector<2x128xf32> -> vector<2x128xf32>
    %c0_44 = arith.constant 0 : index
    %c0_45 = arith.constant 0 : index
    %235 = vector.load %arg6[%c0_44, %c0_45] : memref<1x128xf32, #tpu.memory_space<vmem>>, vector<1x128xf32>
    %236 = vector.broadcast %235 : vector<1x128xf32> to vector<2x128xf32>
    %237 = arith.addf %234, %236 : vector<2x128xf32>
    %c0_46 = arith.constant 0 : index
    %c0_47 = arith.constant 0 : index
    %238 = vector.load %arg7[%c0_46, %c0_47] : memref<2x128xf32, #tpu.memory_space<vmem>>, vector<2x128xf32>
    tpu.vector_store %arg7[%c0_46, %c0_47], %237 {strides = array<i32>} : memref<2x128xf32, #tpu.memory_space<vmem>>, vector<2x128xf32>,
    return
  }
  func.func @transform_0(%arg0: i32) -> (i32, i32) {
    %c0_i32 = arith.constant 0 : i32
    %c0_i32_0 = arith.constant 0 : i32
    %c0_i32_1 = arith.constant 0 : i32
    return %c0_i32, %c0_i32_0 : i32, i32
  }
  func.func @transform_1(%arg0: i32) -> (i32, i32) {
    %c0_i32 = arith.constant 0 : i32
    %c0_i32_0 = arith.constant 0 : i32
    %c0_i32_1 = arith.constant 0 : i32
    return %c0_i32, %c0_i32_0 : i32, i32
  }
  func.func @transform_2(%arg0: i32) -> (i32, i32) {
    %c0_i32 = arith.constant 0 : i32
    %c0_i32_0 = arith.constant 0 : i32
    %c0_i32_1 = arith.constant 0 : i32
    return %c0_i32, %c0_i32_0 : i32, i32
  }
  func.func @transform_3(%arg0: i32) -> (i32, i32) {
    %c0_i32 = arith.constant 0 : i32
    %c0_i32_0 = arith.constant 0 : i32
    %c0_i32_1 = arith.constant 0 : i32
    return %c0_i32, %c0_i32_0 : i32, i32
  }
  func.func @transform_4(%arg0: i32) -> (i32, i32) {
    %c0_i32 = arith.constant 0 : i32
    %c0_i32_0 = arith.constant 0 : i32
    %c0_i32_1 = arith.constant 0 : i32
    return %c0_i32, %c0_i32_0 : i32, i32
  }
  func.func @transform_5(%arg0: i32) -> (i32, i32) {
    %c0_i32 = arith.constant 0 : i32
    %c0_i32_0 = arith.constant 0 : i32
    %c0_i32_1 = arith.constant 0 : i32
    return %c0_i32, %c0_i32_0 : i32, i32
  }
  func.func @transform_6(%arg0: i32) -> (i32, i32) {
    %c0_i32 = arith.constant 0 : i32
    %c0_i32_0 = arith.constant 0 : i32
    %c0_i32_1 = arith.constant 0 : i32
    return %c0_i32, %c0_i32_0 : i32, i32
  }
}

</mosaic_0001>

<bundles_post_ra>
// kernel: tpu_custom_call.1
= control target key start
LH: loop header
LB: loop body
LE: loop exit
PB: predicated region body
PF: predicated region fallthrough
CT: control target
= control target key end

     0   :  { %11 = vsyncpa [#allocation3], 0  ;;  %s997_s0 = inlined_call_operand.vmem [shape: f32[16,4], index: 0, kind: input, shape index: {}]   ;;  %s998_s1 = inlined_call_operand.vmem [shape: f32[4,128], index: 1, kind: input, shape index: {}]   ;;  %s999_s2 = inlined_call_operand.hbm [shape: f32[32,128], index: 2, kind: input, shape index: {}]   ;;  %s1000_s3 = inlined_call_operand.vmem [shape: f32[1,128], index: 3, kind: input, shape index: {}]   ;;  %s1001_s4 = inlined_call_operand.hbm [shape: f32[32,128], index: 4, kind: input, shape index: {}]   ;;  %s1002_s5 = inlined_call_operand.vmem [shape: f32[1,128], index: 5, kind: input, shape index: {}]   ;;  %s1003_s6 = inlined_call_operand.hbm [shape: f32[2,128], index: 6, kind: output, shape index: {}]  }
   0x1   :  { %12 = vsyncpa [#allocation6], 0 }
   0x2   :  { %13 = vsyncpa [#allocation4], 0  ;;  %s22_s23 = sshll.u32 %s999_s2, 4  ;;  %s872_s24 = smov [#allocation2]   ;;  %s23_s23 = int_to_ptr.hbm [resolvable:$true] %s22_s23 }
   0x3   :  { %s24_s25 = sshll.u32 %s872_s24, 4  ;;  %s37_s28 = sshll.u32 %s1001_s4, 4  ;;  %s25_s25 = int_to_ptr.vmem [resolvable:$true] %s24_s25  ;;  %s38_s28 = int_to_ptr.hbm [resolvable:$true] %s37_s28 }
   0x4   :  { %s873_s29 = smov 128   ;;  %s874_s30 = smov 8  }
   0x5   :  { %30 = dma.hbm_to_vmem [thread:$0]  %s23_s23, 512, %s25_s25, [#allocation3], %s873_s29, %s873_s29, %s874_s30  }
   0x6   :  { %s875_s7 = smov [#allocation5]  }
   0x7   :  { %s39_s8 = sshll.u32 %s875_s7, 4  ;;  %s40_s8 = int_to_ptr.vmem [resolvable:$true] %s39_s8 }
   0x8   :  { %45 = dma.hbm_to_vmem [thread:$0]  %s38_s28, 512, %s40_s8, [#allocation6], %s873_s29, %s873_s29, %s874_s30  }
   0x9   :  { %866 = dma.done.wait [#allocation3], 512  }
   0xa   :  { %867 = vsyncadd [#allocation3], 4294966784 }
   0xb   :  { %868 = dma.done.wait [#allocation6], 512  }
   0xc   :  { %869 = vsyncadd [#allocation6], 4294966784  ;;  %vm70_vm0 = vcmask 1043456   ;;  %vm63_vm1 = vcmask 31744   ;;  %v100_v0 = vld [vmem:[#allocation2 + $0x18] sm:$0xff]  ;;  %v99_v1 = vld [vmem:[#allocation2 + $0x10] sm:$0xff] }
   0xd   :  { %v58_v2 = vld [vmem:[%s998_s1] sm:$0xf]  ;;  %117 = vmatpush.msra.mxu1 %v100_v0  ;;  %v98_v4 = vld [vmem:[#allocation2 + $0x8] sm:$0xff]  ;;  %180 = vmatpush.msra.mxu2 %v100_v0  ;;  %v876_v6 = vmov 0.0   ;;  %s877_s12 = smov 64   ;;  %vm101_vm6 = vcmask 261120  }
   0xe   :  { %701 = vmatpush.msk.msra.mxu0 %vm70_vm0, %v58_v2  ;;  %v56_v3 = vld [vmem:[%s997_s0] sm:$0xff]  ;;  %250 = vmatpush.msra.mxu3 %v100_v0  ;;  %s879_s16 = smov [#allocation7]   ;;  %s690_s20 = sshll.u32 %s1003_s6, 4  ;;  %s691_s20 = int_to_ptr.hbm [resolvable:$true] %s690_s20 }
   0xf   :  { %702 = vmatmul.msk.f32.vlgmr.msra.gmra.mxu0 %vm63_vm1, %v56_v3  ;;  %118 = vmatpush.msra.mxu1 %v99_v1  ;;  %v97_v5 = vld [vmem:[#allocation2] sm:$0xff]  ;;  %s688_s17 = sshll.u32 %s879_s16, 4  ;;  %s689_s17 = int_to_ptr.vmem [resolvable:$true] %s688_s17 }
  0x10   :  { %181 = vmatpush.msra.mxu2 %v99_v1  ;;  %526 = vmatpush.msrb.mxu0 %v100_v0  ;;  %v931_v7 = vld [vmem:[%s1000_s3] ss:$0 sm:$0xff]  ;;  %s878_s3 = smov 32  }
  0x11   :  { %119 = vmatpush.msra.mxu1 %v98_v4  ;;  %251 = vmatpush.msra.mxu3 %v99_v1 }
  0x12   :  { %182 = vmatpush.msra.mxu2 %v98_v4  ;;  %527 = vmatpush.msrb.mxu0 %v99_v1 }
  0x13   :  { %120 = vmatpush.msra.mxu1 %v97_v5  ;;  %252 = vmatpush.msra.mxu3 %v98_v4 }
  0x14   :  { %121 = vmatmul.f32.vlgmr.msra.gmra.mxu1 %v876_v6  ;;  %183 = vmatpush.msra.mxu2 %v97_v5 }
  0x15   :  { %253 = vmatpush.msra.mxu3 %v97_v5  ;;  %320 = vmatpush.msrb.mxu1 %v100_v0 }
  0x16   :  { %390 = vmatpush.msrb.mxu2 %v100_v0  ;;  %528 = vmatpush.msrb.mxu0 %v98_v4 }
  0x17   :  { %456 = vmatpush.msrb.mxu3 %v100_v0  ;;  %321 = vmatpush.msrb.mxu1 %v99_v1 }
  0x18   :  { %391 = vmatpush.msrb.mxu2 %v99_v1  ;;  %529 = vmatpush.msrb.mxu0 %v97_v5 }
  0x19   :  { %457 = vmatpush.msrb.mxu3 %v99_v1  ;;  %322 = vmatpush.msrb.mxu1 %v98_v4 }
  0x1a   :  { %392 = vmatpush.msrb.mxu2 %v98_v4 }
  0x1b   :  { %458 = vmatpush.msrb.mxu3 %v98_v4  ;;  %323 = vmatpush.msrb.mxu1 %v97_v5 }
  0x1c   :  { %393 = vmatpush.msrb.mxu2 %v97_v5 }
  0x1d   :  { %459 = vmatpush.msrb.mxu3 %v97_v5  ;;  %596 = vmatpush.msra.mxu1 %v100_v0 }
  0x1f   :  { %597 = vmatpush.msra.mxu1 %v99_v1 }
  0x21   :  { %598 = vmatpush.msra.mxu1 %v98_v4 }
  0x23   :  { %599 = vmatpush.msra.mxu1 %v97_v5 }
  0x8c   :  { %v91_v8 = vpop.f32.mrf.mxu0 }
  0x8d   :  { %v934_v9 = vadd.f32 %v931_v7, %v91_v8 }
  0x91   :  { %v122_v10 = vpop.f32.mrf.mxu1 }
  0x92   :  { %v125_v11 = vadd.f32 %v122_v10, %v934_v9 }
  0x94   :  { %730 = vtanh.f32 %v125_v11  ;;  %v704_v13 = vmul.f32 -1.442695, %v125_v11 }
  0x96   :  { %732 = vpow2.f32 %v704_v13 }
  0x9a   :  { %v731_v12 = vpop.eup %730 }
  0x9b   :  { %148 = vrot.lane.b32.xlu0 %v731_v12, %s877_s12 }
  0x9c   :  { %v733_v14 = vpop.eup %732 }
  0x9d   :  { %v129_v15 = vadd.f32 1.0, %v733_v14 }
  0x9f   :  { %734 = vrcp.f32 %v129_v15  ;;  %v141_v21 = vand.u32 2147483648, %v129_v15  ;;  %vm135_vm3 = vweird.f32 %v129_v15  ;;  %v139_v22 = vand.u32 2147483647, %v129_v15 }
  0xa1   :  { %v142_v24 = vor.u32 1.1754944e-38, %v141_v21  ;;  %vm140_vm5 = vcmp.eq.f32.partialorder %v139_v22, 8.507059e+37 }
  0xa5   :  { %v735_v16 = vpop.eup %734 }
  0xa6   :  { %v131_v17 = vmul.f32 %v735_v16, %v129_v15  ;;  %vm136_vm2 = vweird.f32 %v735_v16 }
  0xa7   :  { %vm137_vm4 = vmor %vm135_vm3, %vm136_vm2 }
  0xa8   :  { %v132_v18 = vsub.f32 1.0, %v131_v17 }
  0xaa   :  { %v133_v19 = vmul.f32 %v735_v16, %v132_v18 }
  0xac   :  { %v134_v20 = vadd.f32 %v735_v16, %v133_v19 }
  0xae   :  { %v138_v23 = vsel %vm137_vm4, %v735_v16, %v134_v20 }
  0xaf   :  { %v143_v26 = vsel %vm140_vm5, %v142_v24, %v138_v23 }
  0xb0   :  { %v146_v28 = vmul.f32 0.0, %v143_v26 }
 0x10d   :  { %v149_v25 = vpop.permute.xlu0 %148 }
 0x10e   :  { %v151_v27 = vmul.f32 %v149_v25, %v143_v26 }
 0x110   :  { %153 = vrot.lane.b32.xlu0 %v151_v27, %s878_s3 }
 0x182   :  { %v154_v29 = vpop.permute.xlu0 %153 }
 0x183   :  { %v156_v30 = vadd.f32 %v154_v29, %v146_v28 }
 0x185   :  { %736 = vtanh.f32 %v156_v30  ;;  %v213_v54 = vrot.slane %v156_v30, 6 }
 0x18b   :  { %v737_v31 = vpop.eup %736 }
 0x18c   :  { %159 = vrot.lane.b32.xlu1 %v737_v31, %s877_s12 }
 0x1fe   :  { %v160_v32 = vpop.permute.xlu1 %159 }
 0x1ff   :  { %v162_v33 = vmul.f32 %v160_v32, %v143_v26 }
 0x201   :  { %164 = vrot.lane.b32.xlu1 %v162_v33, %s878_s3 }
 0x273   :  { %v165_v34 = vpop.permute.xlu1 %164 }
 0x274   :  { %705 = vmatmul.msk.f32.vlgmr.msra.gmra.mxu2 %vm101_vm6, %v165_v34 }
 0x2f7   :  { %v185_v35 = vpop.f32.mrf.mxu2 }
 0x2f8   :  { %v189_v36 = vrot.slane %v185_v35, 6 }
 0x2fa   :  { %v191_v37 = vadd.f32 %v189_v36, %v934_v9 }
 0x2fc   :  { %738 = vtanh.f32 %v191_v37  ;;  %v706_v39 = vmul.f32 -1.442695, %v191_v37 }
 0x2fe   :  { %740 = vpow2.f32 %v706_v39 }
 0x302   :  { %v739_v38 = vpop.eup %738 }
 0x303   :  { %217 = vrot.lane.b32.xlu2 %v739_v38, %s877_s12 }
 0x304   :  { %v741_v40 = vpop.eup %740 }
 0x305   :  { %v195_v41 = vadd.f32 1.0, %v741_v40 }
 0x307   :  { %742 = vrcp.f32 %v195_v41  ;;  %v207_v47 = vand.u32 2147483648, %v195_v41  ;;  %vm201_vm8 = vweird.f32 %v195_v41  ;;  %v205_v48 = vand.u32 2147483647, %v195_v41 }
 0x309   :  { %v208_v50 = vor.u32 1.1754944e-38, %v207_v47  ;;  %vm206_vm10 = vcmp.eq.f32.partialorder %v205_v48, 8.507059e+37 }
 0x30d   :  { %v743_v42 = vpop.eup %742 }
 0x30e   :  { %v197_v43 = vmul.f32 %v743_v42, %v195_v41  ;;  %vm202_vm7 = vweird.f32 %v743_v42 }
 0x30f   :  { %vm203_vm9 = vmor %vm201_vm8, %vm202_vm7 }
 0x310   :  { %v198_v44 = vsub.f32 1.0, %v197_v43 }
 0x312   :  { %v199_v45 = vmul.f32 %v743_v42, %v198_v44 }
 0x314   :  { %v200_v46 = vadd.f32 %v743_v42, %v199_v45 }
 0x316   :  { %v204_v49 = vsel %vm203_vm9, %v743_v42, %v200_v46 }
 0x317   :  { %v209_v52 = vsel %vm206_vm10, %v208_v50, %v204_v49 }
 0x318   :  { %v215_v55 = vmul.f32 %v213_v54, %v209_v52 }
 0x35d   :  { %v218_v51 = vpop.permute.xlu2 %217 }
 0x35e   :  { %v220_v53 = vmul.f32 %v218_v51, %v209_v52 }
 0x360   :  { %222 = vrot.lane.b32.xlu2 %v220_v53, %s878_s3 }
 0x3ba   :  { %v223_v56 = vpop.permute.xlu2 %222 }
 0x3bb   :  { %v225_v57 = vadd.f32 %v223_v56, %v215_v55  ;;  %v57_v55 = vld [vmem:[%s997_s0 + $0x8] sm:$0xff] }
 0x3bc   :  { %703 = vmatmul.msk.f32.gmra.mxu0 %vm63_vm1, %v57_v55 }
 0x3bd   :  { %744 = vtanh.f32 %v225_v57  ;;  %v283_v20 = vrot.slane %v225_v57, 6 }
 0x3c3   :  { %v745_v58 = vpop.eup %744 }
 0x3c4   :  { %228 = vrot.lane.b32.xlu0 %v745_v58, %s877_s12 }
 0x436   :  { %v229_v59 = vpop.permute.xlu0 %228 }
 0x437   :  { %v231_v60 = vmul.f32 %v229_v59, %v209_v52 }
 0x439   :  { %v233_v61 = vrot.slane %v231_v60, 2  ;;  %v94_v57 = vpop.f32.mrf.mxu0 }
 0x43a   :  { %v965_v58 = vadd.f32 %v931_v7, %v94_v57 }
 0x43b   :  { %234 = vrot.lane.b32.xlu1 %v233_v61, %s878_s3 }
 0x4ad   :  { %v235_v62 = vpop.permute.xlu1 %234 }
 0x4ae   :  { %707 = vmatmul.msk.f32.vlgmr.msra.gmra.mxu3 %vm101_vm6, %v235_v62 }
 0x531   :  { %v255_v63 = vpop.f32.mrf.mxu3 }
 0x532   :  { %v259_v0 = vrot.slane %v255_v63, 4 }
 0x534   :  { %v261_v1 = vadd.f32 %v259_v0, %v934_v9 }
 0x536   :  { %746 = vtanh.f32 %v261_v1  ;;  %v708_v3 = vmul.f32 -1.442695, %v261_v1 }
 0x538   :  { %748 = vpow2.f32 %v708_v3 }
 0x53c   :  { %v747_v2 = vpop.eup %746 }
 0x53d   :  { %287 = vrot.lane.b32.xlu2 %v747_v2, %s877_s12 }
 0x53e   :  { %v749_v4 = vpop.eup %748 }
 0x53f   :  { %v265_v5 = vadd.f32 1.0, %v749_v4 }
 0x541   :  { %750 = vrcp.f32 %v265_v5  ;;  %v277_v13 = vand.u32 2147483648, %v265_v5  ;;  %vm271_vm12 = vweird.f32 %v265_v5  ;;  %v275_v14 = vand.u32 2147483647, %v265_v5 }
 0x543   :  { %v278_v16 = vor.u32 1.1754944e-38, %v277_v13  ;;  %vm276_vm14 = vcmp.eq.f32.partialorder %v275_v14, 8.507059e+37 }
 0x547   :  { %v751_v6 = vpop.eup %750 }
 0x548   :  { %v267_v8 = vmul.f32 %v751_v6, %v265_v5  ;;  %vm272_vm11 = vweird.f32 %v751_v6 }
 0x549   :  { %vm273_vm13 = vmor %vm271_vm12, %vm272_vm11 }
 0x54a   :  { %v268_v10 = vsub.f32 1.0, %v267_v8 }
 0x54c   :  { %v269_v11 = vmul.f32 %v751_v6, %v268_v10 }
 0x54e   :  { %v270_v12 = vadd.f32 %v751_v6, %v269_v11 }
 0x550   :  { %v274_v15 = vsel %vm273_vm13, %v751_v6, %v270_v12 }
 0x551   :  { %v279_v18 = vsel %vm276_vm14, %v278_v16, %v274_v15 }
 0x552   :  { %v285_v21 = vmul.f32 %v283_v20, %v279_v18 }
 0x597   :  { %v288_v17 = vpop.permute.xlu2 %287 }
 0x598   :  { %v290_v19 = vmul.f32 %v288_v17, %v279_v18 }
 0x59a   :  { %292 = vrot.lane.b32.xlu0 %v290_v19, %s878_s3 }
 0x60c   :  { %v293_v22 = vpop.permute.xlu0 %292 }
 0x60d   :  { %v295_v23 = vadd.f32 %v293_v22, %v285_v21 }
 0x60f   :  { %752 = vtanh.f32 %v295_v23  ;;  %v353_v47 = vrot.slane %v295_v23, 6 }
 0x615   :  { %v753_v24 = vpop.eup %752 }
 0x616   :  { %298 = vrot.lane.b32.xlu1 %v753_v24, %s877_s12 }
 0x688   :  { %v299_v25 = vpop.permute.xlu1 %298 }
 0x689   :  { %v301_v26 = vmul.f32 %v299_v25, %v279_v18 }
 0x68b   :  { %v303_v27 = vrot.slane %v301_v26, 4 }
 0x68d   :  { %304 = vrot.lane.b32.xlu2 %v303_v27, %s878_s3 }
 0x6e7   :  { %v305_v28 = vpop.permute.xlu2 %304 }
 0x6e8   :  { %709 = vmatmul.msk.f32.vlgmr.msrb.gmra.mxu1 %vm101_vm6, %v305_v28 }
 0x765   :  { %v325_v29 = vpop.f32.mrf.mxu1 }
 0x766   :  { %v329_v30 = vrot.slane %v325_v29, 2 }
 0x768   :  { %v331_v31 = vadd.f32 %v329_v30, %v934_v9 }
 0x76a   :  { %754 = vtanh.f32 %v331_v31  ;;  %v710_v33 = vmul.f32 -1.442695, %v331_v31 }
 0x76c   :  { %756 = vpow2.f32 %v710_v33 }
 0x770   :  { %v755_v32 = vpop.eup %754 }
 0x771   :  { %357 = vrot.lane.b32.xlu0 %v755_v32, %s877_s12 }
 0x772   :  { %v757_v34 = vpop.eup %756 }
 0x773   :  { %v335_v35 = vadd.f32 1.0, %v757_v34 }
 0x775   :  { %758 = vrcp.f32 %v335_v35  ;;  %v347_v41 = vand.u32 2147483648, %v335_v35  ;;  %vm341_vm0 = vweird.f32 %v335_v35  ;;  %v345_v42 = vand.u32 2147483647, %v335_v35 }
 0x777   :  { %v348_v43 = vor.u32 1.1754944e-38, %v347_v41  ;;  %vm346_vm3 = vcmp.eq.f32.partialorder %v345_v42, 8.507059e+37 }
 0x77b   :  { %v759_v36 = vpop.eup %758 }
 0x77c   :  { %v337_v37 = vmul.f32 %v759_v36, %v335_v35  ;;  %vm342_vm15 = vweird.f32 %v759_v36 }
 0x77d   :  { %vm343_vm2 = vmor %vm341_vm0, %vm342_vm15 }
 0x77e   :  { %v338_v38 = vsub.f32 1.0, %v337_v37 }
 0x780   :  { %v339_v39 = vmul.f32 %v759_v36, %v338_v38 }
 0x782   :  { %v340_v40 = vadd.f32 %v759_v36, %v339_v39 }
 0x784   :  { %v344_v9 = vsel %vm343_vm2, %v759_v36, %v340_v40 }
 0x785   :  { %v349_v45 = vsel %vm346_vm3, %v348_v43, %v344_v9 }
 0x786   :  { %v355_v48 = vmul.f32 %v353_v47, %v349_v45 }
 0x7e3   :  { %v358_v44 = vpop.permute.xlu0 %357 }
 0x7e4   :  { %v360_v46 = vmul.f32 %v358_v44, %v349_v45 }
 0x7e6   :  { %362 = vrot.lane.b32.xlu1 %v360_v46, %s878_s3 }
 0x858   :  { %v363_v49 = vpop.permute.xlu1 %362 }
 0x859   :  { %v365_v50 = vadd.f32 %v363_v49, %v355_v48 }
 0x85b   :  { %760 = vtanh.f32 %v365_v50  ;;  %v420_v14 = vrot.slane %v365_v50, 6 }
 0x861   :  { %v761_v51 = vpop.eup %760 }
 0x862   :  { %368 = vrot.lane.b32.xlu2 %v761_v51, %s877_s12 }
 0x8bc   :  { %v369_v52 = vpop.permute.xlu2 %368 }
 0x8bd   :  { %v371_v53 = vmul.f32 %v369_v52, %v349_v45 }
 0x8bf   :  { %v373_v54 = vrot.slane %v371_v53, 6 }
 0x8c1   :  { %374 = vrot.lane.b32.xlu0 %v373_v54, %s878_s3 }
 0x933   :  { %v375_v56 = vpop.permute.xlu0 %374 }
 0x934   :  { %711 = vmatmul.msk.f32.vlgmr.msrb.gmra.mxu2 %vm101_vm6, %v375_v56 }
 0x9b7   :  { %v395_v59 = vpop.f32.mrf.mxu2 }
 0x9b8   :  { %v398_v60 = vadd.f32 %v395_v59, %v965_v58 }
 0x9ba   :  { %762 = vtanh.f32 %v398_v60  ;;  %v712_v62 = vmul.f32 -1.442695, %v398_v60 }
 0x9bc   :  { %764 = vpow2.f32 %v712_v62 }
 0x9c0   :  { %v763_v61 = vpop.eup %762 }
 0x9c1   :  { %424 = vrot.lane.b32.xlu1 %v763_v61, %s877_s12 }
 0x9c2   :  { %v765_v63 = vpop.eup %764 }
 0x9c3   :  { %v402_v0 = vadd.f32 1.0, %v765_v63 }
 0x9c5   :  { %766 = vrcp.f32 %v402_v0  ;;  %v414_v7 = vand.u32 2147483648, %v402_v0  ;;  %vm408_vm4 = vweird.f32 %v402_v0  ;;  %v412_v6 = vand.u32 2147483647, %v402_v0 }
 0x9c7   :  { %v415_v10 = vor.u32 1.1754944e-38, %v414_v7  ;;  %vm413_vm7 = vcmp.eq.f32.partialorder %v412_v6, 8.507059e+37 }
 0x9cb   :  { %v767_v1 = vpop.eup %766 }
 0x9cc   :  { %v404_v2 = vmul.f32 %v767_v1, %v402_v0  ;;  %vm409_vm1 = vweird.f32 %v767_v1 }
 0x9cd   :  { %vm410_vm5 = vmor %vm408_vm4, %vm409_vm1 }
 0x9ce   :  { %v405_v3 = vsub.f32 1.0, %v404_v2 }
 0x9d0   :  { %v406_v4 = vmul.f32 %v767_v1, %v405_v3 }
 0x9d2   :  { %v407_v5 = vadd.f32 %v767_v1, %v406_v4 }
 0x9d4   :  { %v411_v8 = vsel %vm410_vm5, %v767_v1, %v407_v5 }
 0x9d5   :  { %v416_v12 = vsel %vm413_vm7, %v415_v10, %v411_v8 }
 0x9d6   :  { %v422_v15 = vmul.f32 %v420_v14, %v416_v12 }
 0xa33   :  { %v425_v11 = vpop.permute.xlu1 %424 }
 0xa34   :  { %v427_v13 = vmul.f32 %v425_v11, %v416_v12 }
 0xa36   :  { %429 = vrot.lane.b32.xlu2 %v427_v13, %s878_s3 }
 0xa90   :  { %v430_v16 = vpop.permute.xlu2 %429 }
 0xa91   :  { %v432_v17 = vadd.f32 %v430_v16, %v422_v15 }
 0xa93   :  { %768 = vtanh.f32 %v432_v17  ;;  %v489_v41 = vrot.slane %v432_v17, 6 }
 0xa99   :  { %v769_v18 = vpop.eup %768 }
 0xa9a   :  { %435 = vrot.lane.b32.xlu0 %v769_v18, %s877_s12 }
 0xb0c   :  { %v436_v19 = vpop.permute.xlu0 %435 }
 0xb0d   :  { %v438_v20 = vmul.f32 %v436_v19, %v416_v12 }
 0xb0f   :  { %440 = vrot.lane.b32.xlu1 %v438_v20, %s878_s3 }
 0xb81   :  { %v441_v21 = vpop.permute.xlu1 %440 }
 0xb82   :  { %713 = vmatmul.msk.f32.vlgmr.msrb.gmra.mxu3 %vm101_vm6, %v441_v21 }
 0xc05   :  { %v461_v22 = vpop.f32.mrf.mxu3 }
 0xc06   :  { %v465_v23 = vrot.slane %v461_v22, 6 }
 0xc08   :  { %v467_v24 = vadd.f32 %v465_v23, %v965_v58 }
 0xc0a   :  { %770 = vtanh.f32 %v467_v24  ;;  %v714_v26 = vmul.f32 -1.442695, %v467_v24 }
 0xc0c   :  { %772 = vpow2.f32 %v714_v26 }
 0xc10   :  { %v771_v25 = vpop.eup %770 }
 0xc11   :  { %493 = vrot.lane.b32.xlu2 %v771_v25, %s877_s12 }
 0xc12   :  { %v773_v27 = vpop.eup %772 }
 0xc13   :  { %v471_v28 = vadd.f32 1.0, %v773_v27 }
 0xc15   :  { %774 = vrcp.f32 %v471_v28  ;;  %v483_v34 = vand.u32 2147483648, %v471_v28  ;;  %vm477_vm9 = vweird.f32 %v471_v28  ;;  %v481_v35 = vand.u32 2147483647, %v471_v28 }
 0xc17   :  { %v484_v37 = vor.u32 1.1754944e-38, %v483_v34  ;;  %vm482_vm11 = vcmp.eq.f32.partialorder %v481_v35, 8.507059e+37 }
 0xc1b   :  { %v775_v29 = vpop.eup %774 }
 0xc1c   :  { %v473_v30 = vmul.f32 %v775_v29, %v471_v28  ;;  %vm478_vm8 = vweird.f32 %v775_v29 }
 0xc1d   :  { %vm479_vm10 = vmor %vm477_vm9, %vm478_vm8 }
 0xc1e   :  { %v474_v31 = vsub.f32 1.0, %v473_v30 }
 0xc20   :  { %v475_v32 = vmul.f32 %v775_v29, %v474_v31 }
 0xc22   :  { %v476_v33 = vadd.f32 %v775_v29, %v475_v32 }
 0xc24   :  { %v480_v36 = vsel %vm479_vm10, %v775_v29, %v476_v33 }
 0xc25   :  { %v485_v39 = vsel %vm482_vm11, %v484_v37, %v480_v36 }
 0xc26   :  { %v491_v42 = vmul.f32 %v489_v41, %v485_v39  ;;  %v648_v41 = vld [vmem:[#allocation5] sm:$0xff] }
 0xc6b   :  { %v494_v38 = vpop.permute.xlu2 %493 }
 0xc6c   :  { %v496_v40 = vmul.f32 %v494_v38, %v485_v39  ;;  %v651_v38 = vld [vmem:[#allocation5 + $0x18] sm:$0xff] }
 0xc6d   :  { %674 = vmatpush.msra.mxu2 %v651_v38 }
 0xc6e   :  { %498 = vrot.lane.b32.xlu0 %v496_v40, %s878_s3  ;;  %v649_v40 = vld [vmem:[#allocation5 + $0x8] sm:$0xff] }
 0xce0   :  { %v499_v9 = vpop.permute.xlu0 %498 }
 0xce1   :  { %v501_v43 = vadd.f32 %v499_v9, %v491_v42 }
 0xce3   :  { %776 = vtanh.f32 %v501_v43  ;;  %v559_v5 = vrot.slane %v501_v43, 6 }
 0xce9   :  { %v777_v44 = vpop.eup %776 }
 0xcea   :  { %504 = vrot.lane.b32.xlu1 %v777_v44, %s877_s12 }
 0xd5c   :  { %v505_v45 = vpop.permute.xlu1 %504 }
 0xd5d   :  { %v507_v46 = vmul.f32 %v505_v45, %v485_v39  ;;  %v650_v39 = vld [vmem:[#allocation5 + $0x10] sm:$0xff]  ;;  %v729_v45 = vld [vmem:[%s1002_s5] ss:$0 sm:$0xff] }
 0xd5e   :  { %675 = vmatpush.msra.mxu2 %v650_v39 }
 0xd5f   :  { %v509_v47 = vrot.slane %v507_v46, 2 }
 0xd60   :  { %676 = vmatpush.msra.mxu2 %v649_v40 }
 0xd61   :  { %510 = vrot.lane.b32.xlu2 %v509_v47, %s878_s3 }
 0xd62   :  { %677 = vmatpush.msra.mxu2 %v648_v41 }
 0xdbb   :  { %v511_v48 = vpop.permute.xlu2 %510 }
 0xdbc   :  { %715 = vmatmul.msk.f32.vlgmr.msrb.gmra.mxu0 %vm101_vm6, %v511_v48 }
 0xe39   :  { %v531_v49 = vpop.f32.mrf.mxu0 }
 0xe3a   :  { %v535_v50 = vrot.slane %v531_v49, 4 }
 0xe3c   :  { %v537_v51 = vadd.f32 %v535_v50, %v965_v58 }
 0xe3e   :  { %778 = vtanh.f32 %v537_v51  ;;  %v716_v53 = vmul.f32 -1.442695, %v537_v51 }
 0xe40   :  { %780 = vpow2.f32 %v716_v53 }
 0xe44   :  { %v779_v52 = vpop.eup %778 }
 0xe45   :  { %563 = vrot.lane.b32.xlu0 %v779_v52, %s877_s12 }
 0xe46   :  { %v781_v54 = vpop.eup %780 }
 0xe47   :  { %v541_v55 = vadd.f32 1.0, %v781_v54 }
 0xe49   :  { %782 = vrcp.f32 %v541_v55  ;;  %v553_v62 = vand.u32 2147483648, %v541_v55  ;;  %vm547_vm13 = vweird.f32 %v541_v55  ;;  %v551_v63 = vand.u32 2147483647, %v541_v55 }
 0xe4b   :  { %v554_v1 = vor.u32 1.1754944e-38, %v553_v62  ;;  %vm552_vm15 = vcmp.eq.f32.partialorder %v551_v63, 8.507059e+37 }
 0xe4f   :  { %v783_v56 = vpop.eup %782 }
 0xe50   :  { %v543_v57 = vmul.f32 %v783_v56, %v541_v55  ;;  %vm548_vm12 = vweird.f32 %v783_v56 }
 0xe51   :  { %vm549_vm14 = vmor %vm547_vm13, %vm548_vm12 }
 0xe52   :  { %v544_v59 = vsub.f32 1.0, %v543_v57 }
 0xe54   :  { %v545_v60 = vmul.f32 %v783_v56, %v544_v59 }
 0xe56   :  { %v546_v61 = vadd.f32 %v783_v56, %v545_v60 }
 0xe58   :  { %v550_v0 = vsel %vm549_vm14, %v783_v56, %v546_v61 }
 0xe59   :  { %v555_v3 = vsel %vm552_vm15, %v554_v1, %v550_v0 }
 0xe5a   :  { %v561_v7 = vmul.f32 %v559_v5, %v555_v3 }
 0xeb7   :  { %v564_v2 = vpop.permute.xlu0 %563 }
 0xeb8   :  { %v566_v4 = vmul.f32 %v564_v2, %v555_v3 }
 0xeba   :  { %568 = vrot.lane.b32.xlu1 %v566_v4, %s878_s3 }
 0xf2c   :  { %v569_v6 = vpop.permute.xlu1 %568 }
 0xf2d   :  { %v571_v8 = vadd.f32 %v569_v6, %v561_v7 }
 0xf2f   :  { %784 = vtanh.f32 %v571_v8  ;;  %v629_v33 = vrot.slane %v571_v8, 6 }
 0xf35   :  { %v785_v10 = vpop.eup %784 }
 0xf36   :  { %574 = vrot.lane.b32.xlu2 %v785_v10, %s877_s12 }
 0xf90   :  { %v575_v11 = vpop.permute.xlu2 %574 }
 0xf91   :  { %v577_v12 = vmul.f32 %v575_v11, %v555_v3 }
 0xf93   :  { %v579_v13 = vrot.slane %v577_v12, 4 }
 0xf95   :  { %580 = vrot.lane.b32.xlu0 %v579_v13, %s878_s3 }
0x1007   :  { %v581_v14 = vpop.permute.xlu0 %580 }
0x1008   :  { %717 = vmatmul.msk.f32.vlgmr.msra.gmra.mxu1 %vm101_vm6, %v581_v14 }
0x1085   :  { %v601_v15 = vpop.f32.mrf.mxu1 }
0x1086   :  { %v605_v16 = vrot.slane %v601_v15, 2 }
0x1088   :  { %v607_v17 = vadd.f32 %v605_v16, %v965_v58 }
0x108a   :  { %786 = vtanh.f32 %v607_v17  ;;  %v718_v19 = vmul.f32 -1.442695, %v607_v17 }
0x108c   :  { %788 = vpow2.f32 %v718_v19 }
0x1090   :  { %v787_v18 = vpop.eup %786 }
0x1091   :  { %633 = vrot.lane.b32.xlu1 %v787_v18, %s877_s12 }
0x1092   :  { %v789_v20 = vpop.eup %788 }
0x1093   :  { %v611_v21 = vadd.f32 1.0, %v789_v20 }
0x1095   :  { %790 = vrcp.f32 %v611_v21  ;;  %v623_v27 = vand.u32 2147483648, %v611_v21  ;;  %vm617_vm2 = vweird.f32 %v611_v21  ;;  %v621_v28 = vand.u32 2147483647, %v611_v21 }
0x1097   :  { %v624_v29 = vor.u32 1.1754944e-38, %v623_v27  ;;  %vm622_vm1 = vcmp.eq.f32.partialorder %v621_v28, 8.507059e+37 }
0x109b   :  { %v791_v22 = vpop.eup %790 }
0x109c   :  { %v613_v23 = vmul.f32 %v791_v22, %v611_v21  ;;  %vm618_vm0 = vweird.f32 %v791_v22 }
0x109d   :  { %vm619_vm3 = vmor %vm617_vm2, %vm618_vm0 }
0x109e   :  { %v614_v24 = vsub.f32 1.0, %v613_v23 }
0x10a0   :  { %v615_v25 = vmul.f32 %v791_v22, %v614_v24 }
0x10a2   :  { %v616_v26 = vadd.f32 %v791_v22, %v615_v25 }
0x10a4   :  { %v620_v58 = vsel %vm619_vm3, %v791_v22, %v616_v26 }
0x10a5   :  { %v625_v31 = vsel %vm622_vm1, %v624_v29, %v620_v58 }
0x10a6   :  { %v631_v34 = vmul.f32 %v629_v33, %v625_v31 }
0x1103   :  { %v634_v30 = vpop.permute.xlu1 %633 }
0x1104   :  { %v636_v32 = vmul.f32 %v634_v30, %v625_v31 }
0x1106   :  { %638 = vrot.lane.b32.xlu2 %v636_v32, %s878_s3 }
0x1160   :  { %v639_v35 = vpop.permute.xlu2 %638 }
0x1161   :  { %v641_v36 = vadd.f32 %v639_v35, %v631_v34 }
0x1163   :  { %792 = vtanh.f32 %v641_v36 }
0x1169   :  { %v793_v37 = vpop.eup %792 }
0x116a   :  { %644 = vrot.lane.b32.xlu0 %v793_v37, %s877_s12 }
0x11dc   :  { %v645_v42 = vpop.permute.xlu0 %644 }
0x11dd   :  { %v647_v9 = vmul.f32 %v645_v42, %v625_v31 }
0x11df   :  { %v657_v43 = vrot.slane %v647_v9, 6 }
0x11e1   :  { %658 = vrot.lane.b32.xlu1 %v657_v43, %s878_s3 }
0x1253   :  { %v659_v44 = vpop.permute.xlu1 %658 }
0x1254   :  { %719 = vmatmul.msk.f32.vlgmr.msra.gmra.mxu2 %vm101_vm6, %v659_v44 }
0x12d7   :  { %v679_v46 = vpop.f32.mrf.mxu2 }
0x12d8   :  { %v680_v47 = vadd.f32 %v729_v45, %v679_v46 }
0x12da   :  { %682 = vst [vmem:[#allocation7] sm:$0x3] %v680_v47 }
0x12db   :  { %693 = dma.vmem_to_hbm [thread:$0]  %s689_s17, 32, %s691_s20, [#allocation4]  }
0x12dc   :  { %870 = dma.done.wait [#allocation4], 32  }
0x12dd   :  { %871 = vsyncadd [#allocation4], 4294967264 }
0x12de   :  { %698 = vsyncpa [#allocation3], 1 }
0x12df   :  { %699 = vsyncpa [#allocation6], 1 }
0x12e0   :  { %700 = vsyncpa [#allocation4], 1 }

</bundles_post_ra>
